<compile_context>
chip_gen: v5e
topology: v5e:2x2
jax: 0.10.0
libtpu: 0.0.40
codegen_flags: <defaults>
</compile_context>

<pallas_src>
import jax
import jax.numpy as jnp
from jax.experimental import pallas as pl
from jax.experimental.pallas import tpu as pltpu

INPUT_SIZE = 160   # fixed by nn.LSTM(160, ...)
LANE = 128         # TPU vreg lane width
SUBLANE = 8        # TPU vreg sublane count


def _timenet_kernel(x_ref, wih_ref, whh_ref, b_ref, wd_ref, bd_ref, out_ref):
    """Whole TimeNet forward in one grid step.

    x_ref   : (T*Bp, F)  f32  time-major, batch padded to Bp sublanes
    wih_ref : (F, 4H)    f32  input -> gates weights (PyTorch gate order i,f,g,o)
    whh_ref : (H, 4H)    f32  hidden -> gates weights
    b_ref   : (1, 4H)    f32  b_ih + b_hh
    wd_ref  : (H, OUTP)  f32  dense weights, columns padded to a lane multiple
    bd_ref  : (1, OUTP)  f32
    out_ref : (Bp, OUTP) f32  lane-dense output slab (real rows/cols sliced outside)
    """
    H, G = whh_ref.shape                       # G = 4*H, lane-exact (128)
    Bp, _ = out_ref.shape
    T = x_ref.shape[0] // Bp

    # ---- Phase 1: hoisted input projection (one MXU matmul over T*Bp rows) --
    gx = (jnp.dot(x_ref[...], wih_ref[...], preferred_element_type=jnp.float32)
          + b_ref[...])                        # (T*Bp, 4H), bias folded once

    whh = whh_ref[...]                         # loop-invariant, loaded once

    h = jnp.zeros((Bp, H), jnp.float32)
    c = jnp.zeros((Bp, H), jnp.float32)

    # ---- Phase 2: LSTM recurrence, fully static / unrolled (T is small) -----
    for t in range(T):
        gates = (gx[t * Bp:(t + 1) * Bp, :]    # aligned full-sublane tile
                 + jnp.dot(h, whh, preferred_element_type=jnp.float32))
        i_g = jax.nn.sigmoid(gates[:, 0 * H:1 * H])
        f_g = jax.nn.sigmoid(gates[:, 1 * H:2 * H])
        g_g = jnp.tanh(gates[:, 2 * H:3 * H])
        o_g = jax.nn.sigmoid(gates[:, 3 * H:4 * H])
        c = f_g * c + i_g * g_g
        h = o_g * jnp.tanh(c)

    # ---- Phase 3: dropout == identity (eval); fused dense, lane-dense store -
    out_ref[...] = (jnp.dot(h, wd_ref[...], preferred_element_type=jnp.float32)
                    + bd_ref[...])


def timenet_forward(inputs, params):
    """inputs: (B, T, 160) float32, batch_first. Returns (B, out_size) f32."""
    B, T, F = inputs.shape
    assert F == INPUT_SIZE
    H = params["w_hh_t"].shape[0]
    out_size = params["w_d_t"].shape[1]
    G = 4 * H
    # H=32 -> 4H=128: gates are lane-exact, no per-gate padding needed.
    assert G % LANE == 0, "4*hidden_size must be a multiple of 128 lanes"

    Bp = ((B + SUBLANE - 1) // SUBLANE) * SUBLANE        # batch -> full sublane tile
    OUTP = ((out_size + LANE - 1) // LANE) * LANE        # lane-dense output slab

    # Wrapper-side time-major layout + zero batch padding (done once by XLA).
    x_tm = jnp.transpose(inputs.astype(jnp.float32), (1, 0, 2))      # (T, B, F)
    x_tm = jnp.pad(x_tm, ((0, 0), (0, Bp - B), (0, 0)))              # (T, Bp, F)
    x2d = x_tm.reshape(T * Bp, F)                                    # (T*Bp, F)

    wih = params["w_ih_t"].astype(jnp.float32)                       # (F, 4H)
    whh = params["w_hh_t"].astype(jnp.float32)                       # (H, 4H)
    bias = params["bias"].astype(jnp.float32)                        # (1, 4H)
    wd = jnp.pad(params["w_d_t"],
                 ((0, 0), (0, OUTP - out_size))).astype(jnp.float32) # (H, OUTP)
    bd = jnp.pad(params["b_d"],
                 ((0, 0), (0, OUTP - out_size))).astype(jnp.float32) # (1, OUTP)

    out_full = pl.pallas_call(
        _timenet_kernel,
        out_shape=jax.ShapeDtypeStruct((Bp, OUTP), jnp.float32),
        grid_spec=pltpu.PrefetchScalarGridSpec(
            num_scalar_prefetch=0,
            grid=(1,),                       # whole problem: one VMEM-resident step
            in_specs=[
                pl.BlockSpec((T * Bp, F), lambda i: (0, 0)),
                pl.BlockSpec((F, G), lambda i: (0, 0)),
                pl.BlockSpec((H, G), lambda i: (0, 0)),
                pl.BlockSpec((1, G), lambda i: (0, 0)),
                pl.BlockSpec((H, OUTP), lambda i: (0, 0)),
                pl.BlockSpec((1, OUTP), lambda i: (0, 0)),
            ],
            out_specs=pl.BlockSpec((Bp, OUTP), lambda i: (0, 0)),
        ),
        compiler_params=pltpu.CompilerParams(
            dimension_semantics=("arbitrary",),
        ),
    )(x2d, wih, whh, bias, wd, bd)

    return out_full[:B, :out_size]


def init_params(key, hidden_size, out_size):
    """Deterministic synthetic parameters with PyTorch LSTM shapes/gate order."""
    ks = jax.random.split(key, 6)
    scale = 0.1
    w_ih = scale * jax.random.normal(ks[0], (4 * hidden_size, INPUT_SIZE), jnp.float32)
    w_hh = scale * jax.random.normal(ks[1], (4 * hidden_size, hidden_size), jnp.float32)
    b_ih = scale * jax.random.normal(ks[2], (4 * hidden_size,), jnp.float32)
    b_hh = scale * jax.random.normal(ks[3], (4 * hidden_size,), jnp.float32)
    w_d = scale * jax.random.normal(ks[4], (out_size, hidden_size), jnp.float32)
    b_d = scale * jax.random.normal(ks[5], (out_size,), jnp.float32)
    return {
        "w_ih_t": jnp.transpose(w_ih),                    # (160, 4H)
        "w_hh_t": jnp.transpose(w_hh),                    # (H, 4H)
        "bias": (b_ih + b_hh).reshape(1, 4 * hidden_size),
        "w_d_t": jnp.transpose(w_d),                      # (H, out)
        "b_d": b_d.reshape(1, out_size),
    }


def _reference_forward(inputs, params):
    """Pure-JAX f32 reference (PyTorch LSTM gate order, eval-mode dropout)."""
    B, T, _ = inputs.shape
    H = params["w_hh_t"].shape[0]
    wih, whh = params["w_ih_t"], params["w_hh_t"]
    bias = params["bias"][0]
    h = jnp.zeros((B, H), jnp.float32)
    c = jnp.zeros((B, H), jnp.float32)
    for t in range(T):
        gates = inputs[:, t, :] @ wih + h @ whh + bias
        i = jax.nn.sigmoid(gates[:, 0 * H:1 * H])
        f = jax.nn.sigmoid(gates[:, 1 * H:2 * H])
        g = jnp.tanh(gates[:, 2 * H:3 * H])
        o = jax.nn.sigmoid(gates[:, 3 * H:4 * H])
        c = f * c + i * g
        h = o * jnp.tanh(c)
    return h @ params["w_d_t"] + params["b_d"]


if __name__ == "__main__":
    B, T = 2, 8
    hidden_size, out_size = 32, 4

    key = jax.random.PRNGKey(0)
    k_x, k_p = jax.random.split(key)
    inputs = jax.random.normal(k_x, (B, T, INPUT_SIZE), jnp.float32)
    params = init_params(k_p, hidden_size, out_size)

    out = timenet_forward(inputs, params)
    jax.block_until_ready(out)
    assert out.shape == (B, out_size)
    assert bool(jnp.all(jnp.isfinite(out)))

    # Tolerance covers possible reduced-precision MXU passes for f32 matmuls.
    ref = _reference_forward(inputs, params)
    assert bool(jnp.allclose(out, ref, atol=5e-2, rtol=5e-2))

    print("KERNEL_OK")
</pallas_src>

<mosaic_0001>
module attributes {stable_mosaic.version = 11 : i64} {
  func.func @_timenet_kernel(%arg0: i32, %arg1: memref<64x160xf32, #tpu.memory_space<vmem>>, %arg2: memref<160x128xf32, #tpu.memory_space<vmem>>, %arg3: memref<32x128xf32, #tpu.memory_space<vmem>>, %arg4: memref<1x128xf32, #tpu.memory_space<vmem>>, %arg5: memref<32x128xf32, #tpu.memory_space<vmem>>, %arg6: memref<1x128xf32, #tpu.memory_space<vmem>>, %arg7: memref<8x128xf32, #tpu.memory_space<vmem>>) attributes {dimension_semantics = [#tpu.dimension_semantics<arbitrary>], iteration_bounds = array<i64: 1>, scalar_prefetch = 0 : i64, scratch_operands = 0 : i64, tpu.core_type = #tpu.core_type<tc>, window_params = [{pipeline_mode = #tpu.pipeline_mode<synchronous>, transform_indices = @transform_0, window_bounds = array<i64: 64, 160>}, {pipeline_mode = #tpu.pipeline_mode<synchronous>, transform_indices = @transform_1, window_bounds = array<i64: 160, 128>}, {pipeline_mode = #tpu.pipeline_mode<synchronous>, transform_indices = @transform_2, window_bounds = array<i64: 32, 128>}, {pipeline_mode = #tpu.pipeline_mode<synchronous>, transform_indices = @transform_3, window_bounds = array<i64: 1, 128>}, {pipeline_mode = #tpu.pipeline_mode<synchronous>, transform_indices = @transform_4, window_bounds = array<i64: 32, 128>}, {pipeline_mode = #tpu.pipeline_mode<synchronous>, transform_indices = @transform_5, window_bounds = array<i64: 1, 128>}, {pipeline_mode = #tpu.pipeline_mode<synchronous>, transform_indices = @transform_6, window_bounds = array<i64: 8, 128>}]} {
    %c0 = arith.constant 0 : index
    %c0_0 = arith.constant 0 : index
    %0 = vector.load %arg1[%c0, %c0_0] : memref<64x160xf32, #tpu.memory_space<vmem>>, vector<64x160xf32>
    %c0_1 = arith.constant 0 : index
    %c0_2 = arith.constant 0 : index
    %1 = vector.load %arg2[%c0_1, %c0_2] : memref<160x128xf32, #tpu.memory_space<vmem>>, vector<160x128xf32>
    %cst = arith.constant dense<0.000000e+00> : vector<64x128xf32>
    %2 = tpu.matmul %0, %1, %cst {dimension_numbers = #tpu.dot_dimension_numbers<[1], [0], [0], [1], [0, 0, 1, 1], [], []>} : vector<64x160xf32>, vector<160x128xf32>, vector<64x128xf32> -> vector<64x128xf32>
    %c0_3 = arith.constant 0 : index
    %c0_4 = arith.constant 0 : index
    %3 = vector.load %arg4[%c0_3, %c0_4] : memref<1x128xf32, #tpu.memory_space<vmem>>, vector<1x128xf32>
    %4 = vector.broadcast %3 : vector<1x128xf32> to vector<64x128xf32>
    %5 = arith.addf %2, %4 : vector<64x128xf32>
    %c0_5 = arith.constant 0 : index
    %c0_6 = arith.constant 0 : index
    %6 = vector.load %arg3[%c0_5, %c0_6] : memref<32x128xf32, #tpu.memory_space<vmem>>, vector<32x128xf32>
    %cst_7 = arith.constant 0.000000e+00 : f32
    %7 = vector.broadcast %cst_7 : f32 to vector<8x32xf32>
    %cst_8 = arith.constant 0.000000e+00 : f32
    %8 = vector.broadcast %cst_8 : f32 to vector<8x32xf32>
    %9 = vector.extract_strided_slice %5 {offsets = [0, 0], sizes = [8, 128], strides = [1, 1]} : vector<64x128xf32> to vector<8x128xf32>
    %cst_9 = arith.constant dense<0.000000e+00> : vector<8x128xf32>
    %10 = tpu.matmul %7, %6, %cst_9 {dimension_numbers = #tpu.dot_dimension_numbers<[1], [0], [0], [1], [0, 0, 1, 1], [], []>} : vector<8x32xf32>, vector<32x128xf32>, vector<8x128xf32> -> vector<8x128xf32>
    %11 = arith.addf %9, %10 : vector<8x128xf32>
    %12 = vector.extract_strided_slice %11 {offsets = [0, 0], sizes = [8, 32], strides = [1, 1]} : vector<8x128xf32> to vector<8x32xf32>
    %13 = arith.negf %12 : vector<8x32xf32>
    %14 = math.exp %13 : vector<8x32xf32>
    %cst_10 = arith.constant 1.000000e+00 : f32
    %15 = vector.broadcast %cst_10 : f32 to vector<8x32xf32>
    %16 = arith.addf %15, %14 : vector<8x32xf32>
    %17 = arith.divf %15, %16 : vector<8x32xf32>
    %18 = vector.extract_strided_slice %11 {offsets = [0, 32], sizes = [8, 32], strides = [1, 1]} : vector<8x128xf32> to vector<8x32xf32>
    %19 = arith.negf %18 : vector<8x32xf32>
    %20 = math.exp %19 : vector<8x32xf32>
    %cst_11 = arith.constant 1.000000e+00 : f32
    %21 = vector.broadcast %cst_11 : f32 to vector<8x32xf32>
    %22 = arith.addf %21, %20 : vector<8x32xf32>
    %23 = arith.divf %21, %22 : vector<8x32xf32>
    %24 = vector.extract_strided_slice %11 {offsets = [0, 64], sizes = [8, 32], strides = [1, 1]} : vector<8x128xf32> to vector<8x32xf32>
    %25 = math.tanh %24 : vector<8x32xf32>
    %26 = vector.extract_strided_slice %11 {offsets = [0, 96], sizes = [8, 32], strides = [1, 1]} : vector<8x128xf32> to vector<8x32xf32>
    %27 = arith.negf %26 : vector<8x32xf32>
    %28 = math.exp %27 : vector<8x32xf32>
    %cst_12 = arith.constant 1.000000e+00 : f32
    %29 = vector.broadcast %cst_12 : f32 to vector<8x32xf32>
    %30 = arith.addf %29, %28 : vector<8x32xf32>
    %31 = arith.divf %29, %30 : vector<8x32xf32>
    %32 = arith.mulf %23, %8 : vector<8x32xf32>
    %33 = arith.mulf %17, %25 : vector<8x32xf32>
    %34 = arith.addf %32, %33 : vector<8x32xf32>
    %35 = math.tanh %34 : vector<8x32xf32>
    %36 = arith.mulf %31, %35 : vector<8x32xf32>
    %37 = vector.extract_strided_slice %5 {offsets = [8, 0], sizes = [8, 128], strides = [1, 1]} : vector<64x128xf32> to vector<8x128xf32>
    %cst_13 = arith.constant dense<0.000000e+00> : vector<8x128xf32>
    %38 = tpu.matmul %36, %6, %cst_13 {dimension_numbers = #tpu.dot_dimension_numbers<[1], [0], [0], [1], [0, 0, 1, 1], [], []>} : vector<8x32xf32>, vector<32x128xf32>, vector<8x128xf32> -> vector<8x128xf32>
    %39 = arith.addf %37, %38 : vector<8x128xf32>
    %40 = vector.extract_strided_slice %39 {offsets = [0, 0], sizes = [8, 32], strides = [1, 1]} : vector<8x128xf32> to vector<8x32xf32>
    %41 = arith.negf %40 : vector<8x32xf32>
    %42 = math.exp %41 : vector<8x32xf32>
    %cst_14 = arith.constant 1.000000e+00 : f32
    %43 = vector.broadcast %cst_14 : f32 to vector<8x32xf32>
    %44 = arith.addf %43, %42 : vector<8x32xf32>
    %45 = arith.divf %43, %44 : vector<8x32xf32>
    %46 = vector.extract_strided_slice %39 {offsets = [0, 32], sizes = [8, 32], strides = [1, 1]} : vector<8x128xf32> to vector<8x32xf32>
    %47 = arith.negf %46 : vector<8x32xf32>
    %48 = math.exp %47 : vector<8x32xf32>
    %cst_15 = arith.constant 1.000000e+00 : f32
    %49 = vector.broadcast %cst_15 : f32 to vector<8x32xf32>
    %50 = arith.addf %49, %48 : vector<8x32xf32>
    %51 = arith.divf %49, %50 : vector<8x32xf32>
    %52 = vector.extract_strided_slice %39 {offsets = [0, 64], sizes = [8, 32], strides = [1, 1]} : vector<8x128xf32> to vector<8x32xf32>
    %53 = math.tanh %52 : vector<8x32xf32>
    %54 = vector.extract_strided_slice %39 {offsets = [0, 96], sizes = [8, 32], strides = [1, 1]} : vector<8x128xf32> to vector<8x32xf32>
    %55 = arith.negf %54 : vector<8x32xf32>
    %56 = math.exp %55 : vector<8x32xf32>
    %cst_16 = arith.constant 1.000000e+00 : f32
    %57 = vector.broadcast %cst_16 : f32 to vector<8x32xf32>
    %58 = arith.addf %57, %56 : vector<8x32xf32>
    %59 = arith.divf %57, %58 : vector<8x32xf32>
    %60 = arith.mulf %51, %34 : vector<8x32xf32>
    %61 = arith.mulf %45, %53 : vector<8x32xf32>
    %62 = arith.addf %60, %61 : vector<8x32xf32>
    %63 = math.tanh %62 : vector<8x32xf32>
    %64 = arith.mulf %59, %63 : vector<8x32xf32>
    %65 = vector.extract_strided_slice %5 {offsets = [16, 0], sizes = [8, 128], strides = [1, 1]} : vector<64x128xf32> to vector<8x128xf32>
    %cst_17 = arith.constant dense<0.000000e+00> : vector<8x128xf32>
    %66 = tpu.matmul %64, %6, %cst_17 {dimension_numbers = #tpu.dot_dimension_numbers<[1], [0], [0], [1], [0, 0, 1, 1], [], []>} : vector<8x32xf32>, vector<32x128xf32>, vector<8x128xf32> -> vector<8x128xf32>
    %67 = arith.addf %65, %66 : vector<8x128xf32>
    %68 = vector.extract_strided_slice %67 {offsets = [0, 0], sizes = [8, 32], strides = [1, 1]} : vector<8x128xf32> to vector<8x32xf32>
    %69 = arith.negf %68 : vector<8x32xf32>
    %70 = math.exp %69 : vector<8x32xf32>
    %cst_18 = arith.constant 1.000000e+00 : f32
    %71 = vector.broadcast %cst_18 : f32 to vector<8x32xf32>
    %72 = arith.addf %71, %70 : vector<8x32xf32>
    %73 = arith.divf %71, %72 : vector<8x32xf32>
    %74 = vector.extract_strided_slice %67 {offsets = [0, 32], sizes = [8, 32], strides = [1, 1]} : vector<8x128xf32> to vector<8x32xf32>
    %75 = arith.negf %74 : vector<8x32xf32>
    %76 = math.exp %75 : vector<8x32xf32>
    %cst_19 = arith.constant 1.000000e+00 : f32
    %77 = vector.broadcast %cst_19 : f32 to vector<8x32xf32>
    %78 = arith.addf %77, %76 : vector<8x32xf32>
    %79 = arith.divf %77, %78 : vector<8x32xf32>
    %80 = vector.extract_strided_slice %67 {offsets = [0, 64], sizes = [8, 32], strides = [1, 1]} : vector<8x128xf32> to vector<8x32xf32>
    %81 = math.tanh %80 : vector<8x32xf32>
    %82 = vector.extract_strided_slice %67 {offsets = [0, 96], sizes = [8, 32], strides = [1, 1]} : vector<8x128xf32> to vector<8x32xf32>
    %83 = arith.negf %82 : vector<8x32xf32>
    %84 = math.exp %83 : vector<8x32xf32>
    %cst_20 = arith.constant 1.000000e+00 : f32
    %85 = vector.broadcast %cst_20 : f32 to vector<8x32xf32>
    %86 = arith.addf %85, %84 : vector<8x32xf32>
    %87 = arith.divf %85, %86 : vector<8x32xf32>
    %88 = arith.mulf %79, %62 : vector<8x32xf32>
    %89 = arith.mulf %73, %81 : vector<8x32xf32>
    %90 = arith.addf %88, %89 : vector<8x32xf32>
    %91 = math.tanh %90 : vector<8x32xf32>
    %92 = arith.mulf %87, %91 : vector<8x32xf32>
    %93 = vector.extract_strided_slice %5 {offsets = [24, 0], sizes = [8, 128], strides = [1, 1]} : vector<64x128xf32> to vector<8x128xf32>
    %cst_21 = arith.constant dense<0.000000e+00> : vector<8x128xf32>
    %94 = tpu.matmul %92, %6, %cst_21 {dimension_numbers = #tpu.dot_dimension_numbers<[1], [0], [0], [1], [0, 0, 1, 1], [], []>} : vector<8x32xf32>, vector<32x128xf32>, vector<8x128xf32> -> vector<8x128xf32>
    %95 = arith.addf %93, %94 : vector<8x128xf32>
    %96 = vector.extract_strided_slice %95 {offsets = [0, 0], sizes = [8, 32], strides = [1, 1]} : vector<8x128xf32> to vector<8x32xf32>
    %97 = arith.negf %96 : vector<8x32xf32>
    %98 = math.exp %97 : vector<8x32xf32>
    %cst_22 = arith.constant 1.000000e+00 : f32
    %99 = vector.broadcast %cst_22 : f32 to vector<8x32xf32>
    %100 = arith.addf %99, %98 : vector<8x32xf32>
    %101 = arith.divf %99, %100 : vector<8x32xf32>
    %102 = vector.extract_strided_slice %95 {offsets = [0, 32], sizes = [8, 32], strides = [1, 1]} : vector<8x128xf32> to vector<8x32xf32>
    %103 = arith.negf %102 : vector<8x32xf32>
    %104 = math.exp %103 : vector<8x32xf32>
    %cst_23 = arith.constant 1.000000e+00 : f32
    %105 = vector.broadcast %cst_23 : f32 to vector<8x32xf32>
    %106 = arith.addf %105, %104 : vector<8x32xf32>
    %107 = arith.divf %105, %106 : vector<8x32xf32>
    %108 = vector.extract_strided_slice %95 {offsets = [0, 64], sizes = [8, 32], strides = [1, 1]} : vector<8x128xf32> to vector<8x32xf32>
    %109 = math.tanh %108 : vector<8x32xf32>
    %110 = vector.extract_strided_slice %95 {offsets = [0, 96], sizes = [8, 32], strides = [1, 1]} : vector<8x128xf32> to vector<8x32xf32>
    %111 = arith.negf %110 : vector<8x32xf32>
    %112 = math.exp %111 : vector<8x32xf32>
    %cst_24 = arith.constant 1.000000e+00 : f32
    %113 = vector.broadcast %cst_24 : f32 to vector<8x32xf32>
    %114 = arith.addf %113, %112 : vector<8x32xf32>
    %115 = arith.divf %113, %114 : vector<8x32xf32>
    %116 = arith.mulf %107, %90 : vector<8x32xf32>
    %117 = arith.mulf %101, %109 : vector<8x32xf32>
    %118 = arith.addf %116, %117 : vector<8x32xf32>
    %119 = math.tanh %118 : vector<8x32xf32>
    %120 = arith.mulf %115, %119 : vector<8x32xf32>
    %121 = vector.extract_strided_slice %5 {offsets = [32, 0], sizes = [8, 128], strides = [1, 1]} : vector<64x128xf32> to vector<8x128xf32>
    %cst_25 = arith.constant dense<0.000000e+00> : vector<8x128xf32>
    %122 = tpu.matmul %120, %6, %cst_25 {dimension_numbers = #tpu.dot_dimension_numbers<[1], [0], [0], [1], [0, 0, 1, 1], [], []>} : vector<8x32xf32>, vector<32x128xf32>, vector<8x128xf32> -> vector<8x128xf32>
    %123 = arith.addf %121, %122 : vector<8x128xf32>
    %124 = vector.extract_strided_slice %123 {offsets = [0, 0], sizes = [8, 32], strides = [1, 1]} : vector<8x128xf32> to vector<8x32xf32>
    %125 = arith.negf %124 : vector<8x32xf32>
    %126 = math.exp %125 : vector<8x32xf32>
    %cst_26 = arith.constant 1.000000e+00 : f32
    %127 = vector.broadcast %cst_26 : f32 to vector<8x32xf32>
    %128 = arith.addf %127, %126 : vector<8x32xf32>
    %129 = arith.divf %127, %128 : vector<8x32xf32>
    %130 = vector.extract_strided_slice %123 {offsets = [0, 32], sizes = [8, 32], strides = [1, 1]} : vector<8x128xf32> to vector<8x32xf32>
    %131 = arith.negf %130 : vector<8x32xf32>
    %132 = math.exp %131 : vector<8x32xf32>
    %cst_27 = arith.constant 1.000000e+00 : f32
    %133 = vector.broadcast %cst_27 : f32 to vector<8x32xf32>
    %134 = arith.addf %133, %132 : vector<8x32xf32>
    %135 = arith.divf %133, %134 : vector<8x32xf32>
    %136 = vector.extract_strided_slice %123 {offsets = [0, 64], sizes = [8, 32], strides = [1, 1]} : vector<8x128xf32> to vector<8x32xf32>
    %137 = math.tanh %136 : vector<8x32xf32>
    %138 = vector.extract_strided_slice %123 {offsets = [0, 96], sizes = [8, 32], strides = [1, 1]} : vector<8x128xf32> to vector<8x32xf32>
    %139 = arith.negf %138 : vector<8x32xf32>
    %140 = math.exp %139 : vector<8x32xf32>
    %cst_28 = arith.constant 1.000000e+00 : f32
    %141 = vector.broadcast %cst_28 : f32 to vector<8x32xf32>
    %142 = arith.addf %141, %140 : vector<8x32xf32>
    %143 = arith.divf %141, %142 : vector<8x32xf32>
    %144 = arith.mulf %135, %118 : vector<8x32xf32>
    %145 = arith.mulf %129, %137 : vector<8x32xf32>
    %146 = arith.addf %144, %145 : vector<8x32xf32>
    %147 = math.tanh %146 : vector<8x32xf32>
    %148 = arith.mulf %143, %147 : vector<8x32xf32>
    %149 = vector.extract_strided_slice %5 {offsets = [40, 0], sizes = [8, 128], strides = [1, 1]} : vector<64x128xf32> to vector<8x128xf32>
    %cst_29 = arith.constant dense<0.000000e+00> : vector<8x128xf32>
    %150 = tpu.matmul %148, %6, %cst_29 {dimension_numbers = #tpu.dot_dimension_numbers<[1], [0], [0], [1], [0, 0, 1, 1], [], []>} : vector<8x32xf32>, vector<32x128xf32>, vector<8x128xf32> -> vector<8x128xf32>
    %151 = arith.addf %149, %150 : vector<8x128xf32>
    %152 = vector.extract_strided_slice %151 {offsets = [0, 0], sizes = [8, 32], strides = [1, 1]} : vector<8x128xf32> to vector<8x32xf32>
    %153 = arith.negf %152 : vector<8x32xf32>
    %154 = math.exp %153 : vector<8x32xf32>
    %cst_30 = arith.constant 1.000000e+00 : f32
    %155 = vector.broadcast %cst_30 : f32 to vector<8x32xf32>
    %156 = arith.addf %155, %154 : vector<8x32xf32>
    %157 = arith.divf %155, %156 : vector<8x32xf32>
    %158 = vector.extract_strided_slice %151 {offsets = [0, 32], sizes = [8, 32], strides = [1, 1]} : vector<8x128xf32> to vector<8x32xf32>
    %159 = arith.negf %158 : vector<8x32xf32>
    %160 = math.exp %159 : vector<8x32xf32>
    %cst_31 = arith.constant 1.000000e+00 : f32
    %161 = vector.broadcast %cst_31 : f32 to vector<8x32xf32>
    %162 = arith.addf %161, %160 : vector<8x32xf32>
    %163 = arith.divf %161, %162 : vector<8x32xf32>
    %164 = vector.extract_strided_slice %151 {offsets = [0, 64], sizes = [8, 32], strides = [1, 1]} : vector<8x128xf32> to vector<8x32xf32>
    %165 = math.tanh %164 : vector<8x32xf32>
    %166 = vector.extract_strided_slice %151 {offsets = [0, 96], sizes = [8, 32], strides = [1, 1]} : vector<8x128xf32> to vector<8x32xf32>
    %167 = arith.negf %166 : vector<8x32xf32>
    %168 = math.exp %167 : vector<8x32xf32>
    %cst_32 = arith.constant 1.000000e+00 : f32
    %169 = vector.broadcast %cst_32 : f32 to vector<8x32xf32>
    %170 = arith.addf %169, %168 : vector<8x32xf32>
    %171 = arith.divf %169, %170 : vector<8x32xf32>
    %172 = arith.mulf %163, %146 : vector<8x32xf32>
    %173 = arith.mulf %157, %165 : vector<8x32xf32>
    %174 = arith.addf %172, %173 : vector<8x32xf32>
    %175 = math.tanh %174 : vector<8x32xf32>
    %176 = arith.mulf %171, %175 : vector<8x32xf32>
    %177 = vector.extract_strided_slice %5 {offsets = [48, 0], sizes = [8, 128], strides = [1, 1]} : vector<64x128xf32> to vector<8x128xf32>
    %cst_33 = arith.constant dense<0.000000e+00> : vector<8x128xf32>
    %178 = tpu.matmul %176, %6, %cst_33 {dimension_numbers = #tpu.dot_dimension_numbers<[1], [0], [0], [1], [0, 0, 1, 1], [], []>} : vector<8x32xf32>, vector<32x128xf32>, vector<8x128xf32> -> vector<8x128xf32>
    %179 = arith.addf %177, %178 : vector<8x128xf32>
    %180 = vector.extract_strided_slice %179 {offsets = [0, 0], sizes = [8, 32], strides = [1, 1]} : vector<8x128xf32> to vector<8x32xf32>
    %181 = arith.negf %180 : vector<8x32xf32>
    %182 = math.exp %181 : vector<8x32xf32>
    %cst_34 = arith.constant 1.000000e+00 : f32
    %183 = vector.broadcast %cst_34 : f32 to vector<8x32xf32>
    %184 = arith.addf %183, %182 : vector<8x32xf32>
    %185 = arith.divf %183, %184 : vector<8x32xf32>
    %186 = vector.extract_strided_slice %179 {offsets = [0, 32], sizes = [8, 32], strides = [1, 1]} : vector<8x128xf32> to vector<8x32xf32>
    %187 = arith.negf %186 : vector<8x32xf32>
    %188 = math.exp %187 : vector<8x32xf32>
    %cst_35 = arith.constant 1.000000e+00 : f32
    %189 = vector.broadcast %cst_35 : f32 to vector<8x32xf32>
    %190 = arith.addf %189, %188 : vector<8x32xf32>
    %191 = arith.divf %189, %190 : vector<8x32xf32>
    %192 = vector.extract_strided_slice %179 {offsets = [0, 64], sizes = [8, 32], strides = [1, 1]} : vector<8x128xf32> to vector<8x32xf32>
    %193 = math.tanh %192 : vector<8x32xf32>
    %194 = vector.extract_strided_slice %179 {offsets = [0, 96], sizes = [8, 32], strides = [1, 1]} : vector<8x128xf32> to vector<8x32xf32>
    %195 = arith.negf %194 : vector<8x32xf32>
    %196 = math.exp %195 : vector<8x32xf32>
    %cst_36 = arith.constant 1.000000e+00 : f32
    %197 = vector.broadcast %cst_36 : f32 to vector<8x32xf32>
    %198 = arith.addf %197, %196 : vector<8x32xf32>
    %199 = arith.divf %197, %198 : vector<8x32xf32>
    %200 = arith.mulf %191, %174 : vector<8x32xf32>
    %201 = arith.mulf %185, %193 : vector<8x32xf32>
    %202 = arith.addf %200, %201 : vector<8x32xf32>
    %203 = math.tanh %202 : vector<8x32xf32>
    %204 = arith.mulf %199, %203 : vector<8x32xf32>
    %205 = vector.extract_strided_slice %5 {offsets = [56, 0], sizes = [8, 128], strides = [1, 1]} : vector<64x128xf32> to vector<8x128xf32>
    %cst_37 = arith.constant dense<0.000000e+00> : vector<8x128xf32>
    %206 = tpu.matmul %204, %6, %cst_37 {dimension_numbers = #tpu.dot_dimension_numbers<[1], [0], [0], [1], [0, 0, 1, 1], [], []>} : vector<8x32xf32>, vector<32x128xf32>, vector<8x128xf32> -> vector<8x128xf32>
    %207 = arith.addf %205, %206 : vector<8x128xf32>
    %208 = vector.extract_strided_slice %207 {offsets = [0, 0], sizes = [8, 32], strides = [1, 1]} : vector<8x128xf32> to vector<8x32xf32>
    %209 = arith.negf %208 : vector<8x32xf32>
    %210 = math.exp %209 : vector<8x32xf32>
    %cst_38 = arith.constant 1.000000e+00 : f32
    %211 = vector.broadcast %cst_38 : f32 to vector<8x32xf32>
    %212 = arith.addf %211, %210 : vector<8x32xf32>
    %213 = arith.divf %211, %212 : vector<8x32xf32>
    %214 = vector.extract_strided_slice %207 {offsets = [0, 32], sizes = [8, 32], strides = [1, 1]} : vector<8x128xf32> to vector<8x32xf32>
    %215 = arith.negf %214 : vector<8x32xf32>
    %216 = math.exp %215 : vector<8x32xf32>
    %cst_39 = arith.constant 1.000000e+00 : f32
    %217 = vector.broadcast %cst_39 : f32 to vector<8x32xf32>
    %218 = arith.addf %217, %216 : vector<8x32xf32>
    %219 = arith.divf %217, %218 : vector<8x32xf32>
    %220 = vector.extract_strided_slice %207 {offsets = [0, 64], sizes = [8, 32], strides = [1, 1]} : vector<8x128xf32> to vector<8x32xf32>
    %221 = math.tanh %220 : vector<8x32xf32>
    %222 = vector.extract_strided_slice %207 {offsets = [0, 96], sizes = [8, 32], strides = [1, 1]} : vector<8x128xf32> to vector<8x32xf32>
    %223 = arith.negf %222 : vector<8x32xf32>
    %224 = math.exp %223 : vector<8x32xf32>
    %cst_40 = arith.constant 1.000000e+00 : f32
    %225 = vector.broadcast %cst_40 : f32 to vector<8x32xf32>
    %226 = arith.addf %225, %224 : vector<8x32xf32>
    %227 = arith.divf %225, %226 : vector<8x32xf32>
    %228 = arith.mulf %219, %202 : vector<8x32xf32>
    %229 = arith.mulf %213, %221 : vector<8x32xf32>
    %230 = arith.addf %228, %229 : vector<8x32xf32>
    %231 = math.tanh %230 : vector<8x32xf32>
    %232 = arith.mulf %227, %231 : vector<8x32xf32>
    %c0_41 = arith.constant 0 : index
    %c0_42 = arith.constant 0 : index
    %233 = vector.load %arg5[%c0_41, %c0_42] : memref<32x128xf32, #tpu.memory_space<vmem>>, vector<32x128xf32>
    %cst_43 = arith.constant dense<0.000000e+00> : vector<8x128xf32>
    %234 = tpu.matmul %232, %233, %cst_43 {dimension_numbers = #tpu.dot_dimension_numbers<[1], [0], [0], [1], [0, 0, 1, 1], [], []>} : vector<8x32xf32>, vector<32x128xf32>, vector<8x128xf32> -> vector<8x128xf32>
    %c0_44 = arith.constant 0 : index
    %c0_45 = arith.constant 0 : index
    %235 = vector.load %arg6[%c0_44, %c0_45] : memref<1x128xf32, #tpu.memory_space<vmem>>, vector<1x128xf32>
    %236 = vector.broadcast %235 : vector<1x128xf32> to vector<8x128xf32>
    %237 = arith.addf %234, %236 : vector<8x128xf32>
    %c0_46 = arith.constant 0 : index
    %c0_47 = arith.constant 0 : index
    %238 = vector.load %arg7[%c0_46, %c0_47] : memref<8x128xf32, #tpu.memory_space<vmem>>, vector<8x128xf32>
    tpu.vector_store %arg7[%c0_46, %c0_47], %237 {strides = array<i32>} : memref<8x128xf32, #tpu.memory_space<vmem>>, vector<8x128xf32>,
    return
  }
  func.func @transform_0(%arg0: i32) -> (i32, i32) {
    %c0_i32 = arith.constant 0 : i32
    %c0_i32_0 = arith.constant 0 : i32
    %c0_i32_1 = arith.constant 0 : i32
    return %c0_i32, %c0_i32_0 : i32, i32
  }
  func.func @transform_1(%arg0: i32) -> (i32, i32) {
    %c0_i32 = arith.constant 0 : i32
    %c0_i32_0 = arith.constant 0 : i32
    %c0_i32_1 = arith.constant 0 : i32
    return %c0_i32, %c0_i32_0 : i32, i32
  }
  func.func @transform_2(%arg0: i32) -> (i32, i32) {
    %c0_i32 = arith.constant 0 : i32
    %c0_i32_0 = arith.constant 0 : i32
    %c0_i32_1 = arith.constant 0 : i32
    return %c0_i32, %c0_i32_0 : i32, i32
  }
  func.func @transform_3(%arg0: i32) -> (i32, i32) {
    %c0_i32 = arith.constant 0 : i32
    %c0_i32_0 = arith.constant 0 : i32
    %c0_i32_1 = arith.constant 0 : i32
    return %c0_i32, %c0_i32_0 : i32, i32
  }
  func.func @transform_4(%arg0: i32) -> (i32, i32) {
    %c0_i32 = arith.constant 0 : i32
    %c0_i32_0 = arith.constant 0 : i32
    %c0_i32_1 = arith.constant 0 : i32
    return %c0_i32, %c0_i32_0 : i32, i32
  }
  func.func @transform_5(%arg0: i32) -> (i32, i32) {
    %c0_i32 = arith.constant 0 : i32
    %c0_i32_0 = arith.constant 0 : i32
    %c0_i32_1 = arith.constant 0 : i32
    return %c0_i32, %c0_i32_0 : i32, i32
  }
  func.func @transform_6(%arg0: i32) -> (i32, i32) {
    %c0_i32 = arith.constant 0 : i32
    %c0_i32_0 = arith.constant 0 : i32
    %c0_i32_1 = arith.constant 0 : i32
    return %c0_i32, %c0_i32_0 : i32, i32
  }
}

</mosaic_0001>

<bundles_post_ra>
// kernel: tpu_custom_call.1
= control target key start
LH: loop header
LB: loop body
LE: loop exit
PB: predicated region body
PF: predicated region fallthrough
CT: control target
= control target key end

     0   :  { %11 = vsyncpa [#allocation3], 0  ;;  %s1230_s0 = inlined_call_operand.hbm [shape: f32[64,160], index: 0, kind: input, shape index: {}]   ;;  %s1231_s1 = inlined_call_operand.hbm [shape: f32[160,128], index: 1, kind: input, shape index: {}]   ;;  %s1232_s2 = inlined_call_operand.hbm [shape: f32[32,128], index: 2, kind: input, shape index: {}]   ;;  %s1233_s3 = inlined_call_operand.vmem [shape: f32[1,128], index: 3, kind: input, shape index: {}]   ;;  %s1234_s4 = inlined_call_operand.hbm [shape: f32[32,128], index: 4, kind: input, shape index: {}]   ;;  %s1235_s5 = inlined_call_operand.vmem [shape: f32[1,128], index: 5, kind: input, shape index: {}]   ;;  %s1236_s6 = inlined_call_operand.hbm [shape: f32[8,128], index: 6, kind: output, shape index: {}]  }
   0x1   :  { %12 = vsyncpa [#allocation6], 0 }
   0x2   :  { %13 = vsyncpa [#allocation9], 0  ;;  %s32_s23 = sshll.u32 %s1231_s1, 4  ;;  %s33_s23 = int_to_ptr.hbm [resolvable:$true] %s32_s23 }
   0x3   :  { %14 = vsyncpa [#allocation4], 0  ;;  %s1055_s24 = smov [#allocation5]   ;;  %s19_s28 = sshll.u32 %s1230_s0, 4  ;;  %s20_s28 = int_to_ptr.hbm [resolvable:$true] %s19_s28 }
   0x4   :  { %s34_s25 = sshll.u32 %s1055_s24, 4  ;;  %s1056_s29 = smov 128   ;;  %s35_s25 = int_to_ptr.vmem [resolvable:$true] %s34_s25 }
   0x5   :  { %s1057_s30 = smov 8   ;;  %s1058_s7 = smov [#allocation2]  }
   0x6   :  { %40 = dma.hbm_to_vmem [thread:$0]  %s33_s23, 2560, %s35_s25, [#allocation6], %s1056_s29, %s1056_s29, %s1057_s30  }
   0x7   :  { %s21_s8 = sshll.u32 %s1058_s7, 4  ;;  %s1059_s9 = smov 256   ;;  %s22_s8 = int_to_ptr.vmem [resolvable:$true] %s21_s8 }
   0x8   :  { %s1060_s10 = smov 16   ;;  %s45_s12 = sshll.u32 %s1232_s2, 4  ;;  %s46_s12 = int_to_ptr.hbm [resolvable:$true] %s45_s12 }
   0x9   :  { %27 = dma.hbm_to_vmem [thread:$0]  %s20_s28, 2048, %s22_s8, [#allocation3], %s1059_s9, %s1059_s9, %s1060_s10  }
   0xa   :  { %s1061_s13 = smov [#allocation7]   ;;  %s60_s16 = sshll.u32 %s1234_s4, 4  ;;  %s61_s16 = int_to_ptr.hbm [resolvable:$true] %s60_s16 }
   0xb   :  { %s47_s14 = sshll.u32 %s1061_s13, 4  ;;  %s1062_s17 = smov [#allocation8]   ;;  %s48_s14 = int_to_ptr.vmem [resolvable:$true] %s47_s14 }
   0xc   :  { %53 = dma.hbm_to_vmem [thread:$0]  %s46_s12, 512, %s48_s14, [#allocation6], %s1056_s29, %s1056_s29, %s1057_s30  }
   0xd   :  { %s62_s18 = sshll.u32 %s1062_s17, 4  ;;  %s63_s18 = int_to_ptr.vmem [resolvable:$true] %s62_s18 }
   0xe   :  { %68 = dma.hbm_to_vmem [thread:$0]  %s61_s16, 512, %s63_s18, [#allocation9], %s1056_s29, %s1056_s29, %s1057_s30  }
   0xf   :  { %1047 = dma.done.wait [#allocation3], 2048  }
  0x10   :  { %1048 = vsyncadd [#allocation3], 4294965248 }
  0x11   :  { %1049 = dma.done.wait [#allocation6], 3072  }
  0x12   :  { %1050 = vsyncadd [#allocation6], 4294964224 }
  0x13   :  { %1051 = dma.done.wait [#allocation9], 512  }
  0x14   :  { %1052 = vsyncadd [#allocation9], 4294966784  ;;  %v118_v0 = vld [vmem:[#allocation5 + $0x78] sm:$0xff]  ;;  %v117_v2 = vld [vmem:[#allocation5 + $0x70] sm:$0xff]  ;;  %vm127_vm0 = vcmask 261120   ;;  %v1063_v31 = vmov 0.0  }
  0x15   :  { %v122_v1 = vld [vmem:[#allocation5 + $0x98] sm:$0xff]  ;;  %817 = vmatpush.msra.mxu2 %v118_v0  ;;  %v121_v3 = vld [vmem:[#allocation5 + $0x90] sm:$0xff]  ;;  %v116_v4 = vld [vmem:[#allocation5 + $0x68] sm:$0xff]  ;;  %152 = vmatpush.msra.mxu0 %v118_v0  ;;  %s1064_s19 = smov 64   ;;  %s1066_s22 = smov [#allocation10]  }
  0x16   :  { %205 = vmatpush.msra.mxu1 %v122_v1  ;;  %v120_v5 = vld [vmem:[#allocation5 + $0x88] sm:$0xff]  ;;  %818 = vmatpush.msra.mxu3 %v118_v0  ;;  %v115_v6 = vld [vmem:[#allocation5 + $0x60] sm:$0xff]  ;;  %v114_v9 = vld [vmem:[#allocation5 + $0x58] sm:$0xff]  ;;  %s779_s23 = sshll.u32 %s1066_s22, 4  ;;  %s781_s26 = sshll.u32 %s1236_s6, 4  ;;  %s780_s23 = int_to_ptr.vmem [resolvable:$true] %s779_s23  ;;  %s782_s26 = int_to_ptr.hbm [resolvable:$true] %s781_s26 }
  0x17   :  { %819 = vmatpush.msra.mxu2 %v117_v2  ;;  %v119_v7 = vld [vmem:[#allocation5 + $0x80] sm:$0xff]  ;;  %153 = vmatpush.msra.mxu0 %v117_v2  ;;  %v88_v8 = vld [vmem:[#allocation2 + $0x8] sm:$0xff]  ;;  %v113_v10 = vld [vmem:[#allocation5 + $0x50] sm:$0xff] }
  0x18   :  { %206 = vmatpush.msra.mxu1 %v121_v3  ;;  %820 = vmatpush.msra.mxu3 %v117_v2  ;;  %v112_v11 = vld [vmem:[#allocation5 + $0x48] sm:$0xff]  ;;  %v111_v12 = vld [vmem:[#allocation5 + $0x40] sm:$0xff]  ;;  %v90_v13 = vld [vmem:[#allocation2 + $0x18] sm:$0xff] }
  0x19   :  { %821 = vmatpush.msra.mxu2 %v116_v4  ;;  %154 = vmatpush.msra.mxu0 %v116_v4  ;;  %v110_v14 = vld [vmem:[#allocation5 + $0x38] sm:$0xff]  ;;  %v109_v15 = vld [vmem:[#allocation5 + $0x30] sm:$0xff]  ;;  %v108_v16 = vld [vmem:[#allocation5 + $0x28] sm:$0xff] }
  0x1a   :  { %207 = vmatpush.msra.mxu1 %v120_v5  ;;  %822 = vmatpush.msra.mxu3 %v116_v4  ;;  %v107_v17 = vld [vmem:[#allocation5 + $0x20] sm:$0xff]  ;;  %v92_v18 = vld [vmem:[#allocation2 + $0x28] sm:$0xff]  ;;  %v106_v19 = vld [vmem:[#allocation5 + $0x18] sm:$0xff] }
  0x1b   :  { %823 = vmatpush.msra.mxu2 %v115_v6  ;;  %155 = vmatpush.msra.mxu0 %v115_v6  ;;  %v105_v20 = vld [vmem:[#allocation5 + $0x10] sm:$0xff]  ;;  %v104_v21 = vld [vmem:[#allocation5 + $0x8] sm:$0xff]  ;;  %v103_v22 = vld [vmem:[#allocation5] sm:$0xff] }
  0x1c   :  { %208 = vmatpush.msra.mxu1 %v119_v7  ;;  %824 = vmatpush.msra.mxu3 %v115_v6  ;;  %v97_v23 = vld [vmem:[#allocation2 + $0x50] sm:$0xff]  ;;  %v94_v24 = vld [vmem:[#allocation2 + $0x38] sm:$0xff]  ;;  %v87_v26 = vld [vmem:[#allocation2] sm:$0xff] }
  0x1d   :  { %793 = vmatmul.msk.f32.vlgmr.msra.gmra.mxu1 %vm127_vm0, %v88_v8  ;;  %825 = vmatpush.msra.mxu2 %v114_v9  ;;  %v1117_v25 = vld [vmem:[#allocation7 + $0x18] sm:$0xff]  ;;  %v1120_v27 = vld [vmem:[#allocation7 + $0x10] sm:$0xff]  ;;  %v1123_v28 = vld [vmem:[#allocation7 + $0x8] sm:$0xff] }
  0x1e   :  { %156 = vmatpush.msra.mxu0 %v114_v9  ;;  %826 = vmatpush.msra.mxu3 %v114_v9  ;;  %v1127_v29 = vld [vmem:[#allocation7] sm:$0xff]  ;;  %v96_v30 = vld [vmem:[#allocation2 + $0x48] sm:$0xff]  ;;  %v98_v32 = vld [vmem:[#allocation2 + $0x58] sm:$0xff] }
  0x1f   :  { %827 = vmatpush.msra.mxu2 %v113_v10  ;;  %v1147_v34 = vld [vmem:[%s1233_s3] ss:$0 sm:$0xff]  ;;  %s1065_s3 = smov 32   ;;  %v100_v62 = vld [vmem:[#allocation2 + $0x68] sm:$0xff]  ;;  %v101_v63 = vld [vmem:[#allocation2 + $0x70] sm:$0xff] }
  0x20   :  { %157 = vmatpush.msra.mxu0 %v113_v10  ;;  %828 = vmatpush.msra.mxu3 %v113_v10  ;;  %v99_v61 = vld [vmem:[#allocation2 + $0x60] sm:$0xff]  ;;  %v102_v2 = vld [vmem:[#allocation2 + $0x78] sm:$0xff]  ;;  %v89_v3 = vld [vmem:[#allocation2 + $0x10] sm:$0xff] }
  0x21   :  { %829 = vmatpush.msra.mxu2 %v112_v11 }
  0x22   :  { %158 = vmatpush.msra.mxu0 %v112_v11  ;;  %830 = vmatpush.msra.mxu3 %v112_v11 }
  0x23   :  { %831 = vmatpush.msra.mxu2 %v111_v12 }
  0x24   :  { %159 = vmatpush.msra.mxu0 %v111_v12  ;;  %832 = vmatpush.msra.mxu3 %v111_v12 }
  0x25   :  { %794 = vmatmul.msk.f32.gmra.mxu1 %vm127_vm0, %v90_v13  ;;  %833 = vmatpush.msra.mxu2 %v110_v14 }
  0x26   :  { %160 = vmatpush.msra.mxu0 %v110_v14  ;;  %834 = vmatpush.msra.mxu3 %v110_v14 }
  0x27   :  { %835 = vmatpush.msra.mxu2 %v109_v15 }
  0x28   :  { %161 = vmatpush.msra.mxu0 %v109_v15  ;;  %836 = vmatpush.msra.mxu3 %v109_v15 }
  0x29   :  { %837 = vmatpush.msra.mxu2 %v108_v16 }
  0x2a   :  { %162 = vmatpush.msra.mxu0 %v108_v16  ;;  %838 = vmatpush.msra.mxu3 %v108_v16 }
  0x2b   :  { %839 = vmatpush.msra.mxu2 %v107_v17 }
  0x2c   :  { %163 = vmatpush.msra.mxu0 %v107_v17  ;;  %840 = vmatpush.msra.mxu3 %v107_v17 }
  0x2d   :  { %795 = vmatmul.msk.f32.gmra.mxu1 %vm127_vm0, %v92_v18  ;;  %841 = vmatpush.msra.mxu2 %v106_v19 }
  0x2e   :  { %164 = vmatpush.msra.mxu0 %v106_v19  ;;  %842 = vmatpush.msra.mxu3 %v106_v19 }
  0x2f   :  { %843 = vmatpush.msra.mxu2 %v105_v20 }
  0x30   :  { %165 = vmatpush.msra.mxu0 %v105_v20  ;;  %844 = vmatpush.msra.mxu3 %v105_v20 }
  0x31   :  { %845 = vmatpush.msra.mxu2 %v104_v21 }
  0x32   :  { %166 = vmatpush.msra.mxu0 %v104_v21  ;;  %846 = vmatpush.msra.mxu3 %v104_v21 }
  0x33   :  { %847 = vmatpush.msra.mxu2 %v103_v22 }
  0x34   :  { %183 = vmatmul.f32.vlgmr.msra.gmra.mxu2 %v97_v23  ;;  %167 = vmatpush.msra.mxu0 %v103_v22 }
  0x35   :  { %796 = vmatmul.msk.f32.gmra.mxu1 %vm127_vm0, %v94_v24  ;;  %253 = vmatpush.msrb.mxu2 %v1117_v25 }
  0x36   :  { %168 = vmatmul.f32.vlgmr.msra.gmra.mxu0 %v87_v26  ;;  %848 = vmatpush.msra.mxu3 %v103_v22 }
  0x37   :  { %254 = vmatpush.msrb.mxu2 %v1120_v27  ;;  %186 = vmatmul.f32.vlgmr.msra.gmra.mxu3 %v99_v61 }
  0x38   :  { %316 = vmatpush.msrb.mxu3 %v1117_v25 }
  0x39   :  { %255 = vmatpush.msrb.mxu2 %v1123_v28 }
  0x3a   :  { %317 = vmatpush.msrb.mxu3 %v1120_v27 }
  0x3b   :  { %256 = vmatpush.msrb.mxu2 %v1127_v29 }
  0x3c   :  { %318 = vmatpush.msrb.mxu3 %v1123_v28  ;;  %257 = vmatmul.f32.vlgmr.msrb.gmra.mxu2 %v1063_v31 }
  0x3d   :  { %797 = vmatmul.msk.f32.gmra.mxu1 %vm127_vm0, %v96_v30  ;;  %379 = vmatpush.msra.mxu2 %v1117_v25 }
  0x3e   :  { %319 = vmatpush.msrb.mxu3 %v1127_v29  ;;  %171 = vmatmul.f32.gmra.mxu0 %v89_v3 }
  0x3f   :  { %380 = vmatpush.msra.mxu2 %v1120_v27  ;;  %189 = vmatmul.f32.gmra.mxu3 %v101_v63 }
  0x40   :  { %442 = vmatpush.msra.mxu3 %v1117_v25 }
  0x41   :  { %381 = vmatpush.msra.mxu2 %v1123_v28 }
  0x42   :  { %443 = vmatpush.msra.mxu3 %v1120_v27 }
  0x43   :  { %382 = vmatpush.msra.mxu2 %v1127_v29 }
  0x44   :  { %444 = vmatpush.msra.mxu3 %v1123_v28 }
  0x45   :  { %798 = vmatmul.msk.f32.gmra.mxu1 %vm127_vm0, %v98_v32  ;;  %505 = vmatpush.msrb.mxu2 %v1117_v25 }
  0x46   :  { %445 = vmatpush.msra.mxu3 %v1127_v29 }
  0x47   :  { %506 = vmatpush.msrb.mxu2 %v1120_v27 }
  0x49   :  { %507 = vmatpush.msrb.mxu2 %v1123_v28 }
  0x4b   :  { %508 = vmatpush.msrb.mxu2 %v1127_v29 }
  0x4d   :  { %799 = vmatmul.msk.f32.gmra.mxu1 %vm127_vm0, %v100_v62 }
  0x55   :  { %800 = vmatmul.msk.f32.gmra.mxu1 %vm127_vm0, %v102_v2 }
  0x9a   :  { %v210_v37 = vpop.f32.mrf.mxu1 }
  0xa2   :  { %v213_v9 = vpop.f32.mrf.mxu1 }
  0xb3   :  { %v169_v33 = vpop.f32.mrf.mxu0 }
  0xb4   :  { %v170_v36 = vadd.f32 %v1147_v34, %v169_v33 }
  0xb6   :  { %v211_v38 = vadd.f32 %v210_v37, %v170_v36 }
  0xb7   :  { %v1149_v35 = vpop.f32.mrf.mxu2 }
  0xba   :  { %v1167_v5 = vpop.f32.mrf.mxu3 }
  0xbb   :  { %v172_v7 = vpop.f32.mrf.mxu0 }
  0xbc   :  { %v173_v8 = vadd.f32 %v1147_v34, %v172_v7 }
  0xbe   :  { %v214_v10 = vadd.f32 %v213_v9, %v173_v8  ;;  %v93_v9 = vld [vmem:[#allocation2 + $0x30] sm:$0xff] }
  0xbf   :  { %v258_v39 = vpop.f32.mrf.mxu2 }
  0xc0   :  { %v261_v40 = vadd.f32 %v258_v39, %v211_v38 }
  0xc2   :  { %863 = vtanh.f32 %v261_v40  ;;  %v801_v42 = vmul.f32 -1.442695, %v261_v40  ;;  %v1169_v6 = vpop.f32.mrf.mxu3 }
  0xc4   :  { %865 = vpow2.f32 %v801_v42 }
  0xc8   :  { %v864_v41 = vpop.eup %863 }
  0xc9   :  { %284 = vrot.lane.b32.xlu0 %v864_v41, %s1064_s19  ;;  %v91_v41 = vld [vmem:[#allocation2 + $0x20] sm:$0xff] }
  0xca   :  { %v866_v43 = vpop.eup %865  ;;  %174 = vmatmul.f32.gmra.mxu0 %v91_v41  ;;  %v95_v41 = vld [vmem:[#allocation2 + $0x40] sm:$0xff] }
  0xcb   :  { %v265_v44 = vadd.f32 1.0, %v866_v43 }
  0xcd   :  { %867 = vrcp.f32 %v265_v44  ;;  %v277_v50 = vand.u32 2147483648, %v265_v44  ;;  %vm271_vm2 = vweird.f32 %v265_v44  ;;  %v275_v51 = vand.u32 2147483647, %v265_v44 }
  0xcf   :  { %v278_v53 = vor.u32 1.1754944e-38, %v277_v50  ;;  %vm276_vm4 = vcmp.eq.f32.partialorder %v275_v51, 8.507059e+37 }
  0xd2   :  { %177 = vmatmul.f32.gmra.mxu0 %v93_v9 }
  0xd3   :  { %v868_v45 = vpop.eup %867 }
  0xd4   :  { %v267_v46 = vmul.f32 %v868_v45, %v265_v44  ;;  %vm272_vm1 = vweird.f32 %v868_v45 }
  0xd5   :  { %vm273_vm3 = vmor %vm271_vm2, %vm272_vm1 }
  0xd6   :  { %v268_v47 = vsub.f32 1.0, %v267_v46 }
  0xd8   :  { %v269_v48 = vmul.f32 %v868_v45, %v268_v47 }
  0xda   :  { %v270_v49 = vadd.f32 %v868_v45, %v269_v48  ;;  %180 = vmatmul.f32.gmra.mxu0 %v95_v41 }
  0xdc   :  { %v274_v52 = vsel %vm273_vm3, %v868_v45, %v270_v49  ;;  %v216_v45 = vpop.f32.mrf.mxu1 }
  0xdd   :  { %v279_v55 = vsel %vm276_vm4, %v278_v53, %v274_v52 }
  0xde   :  { %v282_v57 = vmul.f32 0.0, %v279_v55 }
 0x13b   :  { %v285_v54 = vpop.permute.xlu0 %284 }
 0x13c   :  { %v287_v56 = vmul.f32 %v285_v54, %v279_v55 }
 0x13e   :  { %289 = vrot.lane.b32.xlu0 %v287_v56, %s1065_s3 }
 0x147   :  { %v175_v43 = vpop.f32.mrf.mxu0 }
 0x148   :  { %v176_v44 = vadd.f32 %v1147_v34, %v175_v43 }
 0x14a   :  { %v217_v46 = vadd.f32 %v216_v45, %v176_v44 }
 0x1b0   :  { %v290_v58 = vpop.permute.xlu0 %289 }
 0x1b1   :  { %v292_v59 = vadd.f32 %v290_v58, %v282_v57 }
 0x1b3   :  { %869 = vtanh.f32 %v292_v59 }
 0x1b9   :  { %v870_v60 = vpop.eup %869 }
 0x1ba   :  { %295 = vrot.lane.b32.xlu1 %v870_v60, %s1064_s19 }
 0x22c   :  { %v296_v0 = vpop.permute.xlu1 %295 }
 0x22d   :  { %v298_v1 = vmul.f32 %v296_v0, %v279_v55 }
 0x22f   :  { %300 = vrot.lane.b32.xlu1 %v298_v1, %s1065_s3 }
 0x2a1   :  { %v301_v4 = vpop.permute.xlu1 %300 }
 0x2a2   :  { %802 = vmatmul.msk.f32.vlgmr.msrb.gmra.mxu3 %vm127_vm0, %v301_v4 }
 0x2a3   :  { %568 = vmatpush.msrb.mxu3 %v1117_v25 }
 0x2a5   :  { %569 = vmatpush.msrb.mxu3 %v1120_v27 }
 0x2a7   :  { %570 = vmatpush.msrb.mxu3 %v1123_v28 }
 0x2a9   :  { %571 = vmatpush.msrb.mxu3 %v1127_v29 }
 0x325   :  { %v321_v11 = vpop.f32.mrf.mxu3 }
 0x326   :  { %v324_v12 = vadd.f32 %v321_v11, %v214_v10  ;;  %v178_v11 = vpop.f32.mrf.mxu0 }
 0x328   :  { %871 = vtanh.f32 %v324_v12  ;;  %v803_v14 = vmul.f32 -1.442695, %v324_v12  ;;  %v179_v12 = vadd.f32 %v1147_v34, %v178_v11  ;;  %v185_v11 = vadd.f32 %v1147_v34, %v1149_v35 }
 0x32a   :  { %873 = vpow2.f32 %v803_v14 }
 0x32e   :  { %v872_v13 = vpop.eup %871  ;;  %v181_v43 = vpop.f32.mrf.mxu0 }
 0x32f   :  { %347 = vrot.lane.b32.xlu2 %v872_v13, %s1064_s19  ;;  %v219_v13 = vpop.f32.mrf.mxu1  ;;  %v182_v44 = vadd.f32 %v1147_v34, %v181_v43 }
 0x330   :  { %v874_v15 = vpop.eup %873  ;;  %v220_v14 = vadd.f32 %v219_v13, %v179_v12 }
 0x331   :  { %v328_v16 = vadd.f32 1.0, %v874_v15 }
 0x333   :  { %875 = vrcp.f32 %v328_v16  ;;  %v340_v22 = vand.u32 2147483648, %v328_v16  ;;  %vm334_vm6 = vweird.f32 %v328_v16  ;;  %v338_v23 = vand.u32 2147483647, %v328_v16 }
 0x335   :  { %v341_v26 = vor.u32 1.1754944e-38, %v340_v22  ;;  %vm339_vm8 = vcmp.eq.f32.partialorder %v338_v23, 8.507059e+37 }
 0x337   :  { %v222_v45 = vpop.f32.mrf.mxu1 }
 0x339   :  { %v876_v17 = vpop.eup %875 }
 0x33a   :  { %v330_v18 = vmul.f32 %v876_v17, %v328_v16  ;;  %vm335_vm5 = vweird.f32 %v876_v17 }
 0x33b   :  { %vm336_vm7 = vmor %vm334_vm6, %vm335_vm5 }
 0x33c   :  { %v331_v19 = vsub.f32 1.0, %v330_v18 }
 0x33e   :  { %v332_v20 = vmul.f32 %v876_v17, %v331_v19 }
 0x340   :  { %v333_v21 = vadd.f32 %v876_v17, %v332_v20 }
 0x342   :  { %v337_v24 = vsel %vm336_vm7, %v876_v17, %v333_v21 }
 0x343   :  { %v342_v31 = vsel %vm339_vm8, %v341_v26, %v337_v24 }
 0x344   :  { %v345_v33 = vmul.f32 %v342_v31, %v292_v59 }
 0x389   :  { %v348_v30 = vpop.permute.xlu2 %347 }
 0x38a   :  { %v350_v32 = vmul.f32 %v348_v30, %v342_v31 }
 0x38c   :  { %352 = vrot.lane.b32.xlu2 %v350_v32, %s1065_s3 }
 0x3e6   :  { %v353_v36 = vpop.permute.xlu2 %352 }
 0x3e7   :  { %v355_v37 = vadd.f32 %v353_v36, %v345_v33 }
 0x3e9   :  { %877 = vtanh.f32 %v355_v37 }
 0x3ef   :  { %v878_v38 = vpop.eup %877 }
 0x3f0   :  { %358 = vrot.lane.b32.xlu0 %v878_v38, %s1064_s19 }
 0x462   :  { %v359_v39 = vpop.permute.xlu0 %358 }
 0x463   :  { %v361_v40 = vmul.f32 %v359_v39, %v342_v31 }
 0x465   :  { %363 = vrot.lane.b32.xlu1 %v361_v40, %s1065_s3 }
 0x4d7   :  { %v364_v42 = vpop.permute.xlu1 %363 }
 0x4d8   :  { %804 = vmatmul.msk.f32.vlgmr.msra.gmra.mxu2 %vm127_vm0, %v364_v42 }
 0x4d9   :  { %631 = vmatpush.msra.mxu2 %v1117_v25 }
 0x4db   :  { %632 = vmatpush.msra.mxu2 %v1120_v27 }
 0x4dd   :  { %633 = vmatpush.msra.mxu2 %v1123_v28 }
 0x4df   :  { %634 = vmatpush.msra.mxu2 %v1127_v29 }
 0x55b   :  { %v384_v47 = vpop.f32.mrf.mxu2 }
 0x55c   :  { %v387_v48 = vadd.f32 %v384_v47, %v217_v46  ;;  %v223_v46 = vadd.f32 %v222_v45, %v182_v44 }
 0x55e   :  { %879 = vtanh.f32 %v387_v48  ;;  %v805_v50 = vmul.f32 -1.442695, %v387_v48 }
 0x560   :  { %881 = vpow2.f32 %v805_v50 }
 0x564   :  { %v880_v49 = vpop.eup %879 }
 0x565   :  { %410 = vrot.lane.b32.xlu2 %v880_v49, %s1064_s19 }
 0x566   :  { %v882_v51 = vpop.eup %881 }
 0x567   :  { %v391_v52 = vadd.f32 1.0, %v882_v51 }
 0x569   :  { %883 = vrcp.f32 %v391_v52  ;;  %v403_v58 = vand.u32 2147483648, %v391_v52  ;;  %vm397_vm10 = vweird.f32 %v391_v52  ;;  %v401_v59 = vand.u32 2147483647, %v391_v52 }
 0x56b   :  { %v404_v61 = vor.u32 1.1754944e-38, %v403_v58  ;;  %vm402_vm12 = vcmp.eq.f32.partialorder %v401_v59, 8.507059e+37 }
 0x56f   :  { %v884_v53 = vpop.eup %883 }
 0x570   :  { %v393_v54 = vmul.f32 %v884_v53, %v391_v52  ;;  %vm398_vm9 = vweird.f32 %v884_v53 }
 0x571   :  { %vm399_vm11 = vmor %vm397_vm10, %vm398_vm9 }
 0x572   :  { %v394_v55 = vsub.f32 1.0, %v393_v54 }
 0x574   :  { %v395_v56 = vmul.f32 %v884_v53, %v394_v55 }
 0x576   :  { %v396_v57 = vadd.f32 %v884_v53, %v395_v56 }
 0x578   :  { %v400_v60 = vsel %vm399_vm11, %v884_v53, %v396_v57 }
 0x579   :  { %v405_v63 = vsel %vm402_vm12, %v404_v61, %v400_v60 }
 0x57a   :  { %v408_v1 = vmul.f32 %v405_v63, %v355_v37 }
 0x5bf   :  { %v411_v62 = vpop.permute.xlu2 %410 }
 0x5c0   :  { %v413_v0 = vmul.f32 %v411_v62, %v405_v63 }
 0x5c2   :  { %415 = vrot.lane.b32.xlu0 %v413_v0, %s1065_s3 }
 0x634   :  { %v416_v2 = vpop.permute.xlu0 %415 }
 0x635   :  { %v418_v3 = vadd.f32 %v416_v2, %v408_v1 }
 0x637   :  { %885 = vtanh.f32 %v418_v3 }
 0x63d   :  { %v886_v4 = vpop.eup %885 }
 0x63e   :  { %421 = vrot.lane.b32.xlu1 %v886_v4, %s1064_s19 }
 0x6b0   :  { %v422_v7 = vpop.permute.xlu1 %421 }
 0x6b1   :  { %v424_v8 = vmul.f32 %v422_v7, %v405_v63 }
 0x6b3   :  { %426 = vrot.lane.b32.xlu2 %v424_v8, %s1065_s3 }
 0x70d   :  { %v427_v10 = vpop.permute.xlu2 %426 }
 0x70e   :  { %806 = vmatmul.msk.f32.vlgmr.msra.gmra.mxu3 %vm127_vm0, %v427_v10  ;;  %v225_v10 = vpop.f32.mrf.mxu1 }
 0x70f   :  { %694 = vmatpush.msra.mxu3 %v1117_v25  ;;  %v226_v12 = vadd.f32 %v225_v10, %v185_v11 }
 0x711   :  { %695 = vmatpush.msra.mxu3 %v1120_v27 }
 0x713   :  { %696 = vmatpush.msra.mxu3 %v1123_v28 }
 0x715   :  { %697 = vmatpush.msra.mxu3 %v1127_v29 }
 0x791   :  { %v447_v15 = vpop.f32.mrf.mxu3 }
 0x792   :  { %v450_v16 = vadd.f32 %v447_v15, %v220_v14 }
 0x794   :  { %887 = vtanh.f32 %v450_v16  ;;  %v807_v18 = vmul.f32 -1.442695, %v450_v16 }
 0x796   :  { %889 = vpow2.f32 %v807_v18 }
 0x79a   :  { %v888_v17 = vpop.eup %887 }
 0x79b   :  { %473 = vrot.lane.b32.xlu0 %v888_v17, %s1064_s19 }
 0x79c   :  { %v890_v25 = vpop.eup %889 }
 0x79d   :  { %v454_v19 = vadd.f32 1.0, %v890_v25 }
 0x79f   :  { %891 = vrcp.f32 %v454_v19  ;;  %v466_v22 = vand.u32 2147483648, %v454_v19  ;;  %vm460_vm14 = vweird.f32 %v454_v19  ;;  %v464_v23 = vand.u32 2147483647, %v454_v19 }
 0x7a1   :  { %v467_v26 = vor.u32 1.1754944e-38, %v466_v22  ;;  %vm465_vm1 = vcmp.eq.f32.partialorder %v464_v23, 8.507059e+37 }
 0x7a5   :  { %v892_v27 = vpop.eup %891 }
 0x7a6   :  { %v456_v28 = vmul.f32 %v892_v27, %v454_v19  ;;  %vm461_vm13 = vweird.f32 %v892_v27 }
 0x7a7   :  { %vm462_vm15 = vmor %vm460_vm14, %vm461_vm13 }
 0x7a8   :  { %v457_v20 = vsub.f32 1.0, %v456_v28 }
 0x7aa   :  { %v458_v29 = vmul.f32 %v892_v27, %v457_v20 }
 0x7ac   :  { %v459_v21 = vadd.f32 %v892_v27, %v458_v29 }
 0x7ae   :  { %v463_v24 = vsel %vm462_vm15, %v892_v27, %v459_v21 }
 0x7af   :  { %v468_v31 = vsel %vm465_vm1, %v467_v26, %v463_v24 }
 0x7b0   :  { %v471_v33 = vmul.f32 %v468_v31, %v418_v3 }
 0x80d   :  { %v474_v30 = vpop.permute.xlu0 %473 }
 0x80e   :  { %v476_v32 = vmul.f32 %v474_v30, %v468_v31 }
 0x810   :  { %478 = vrot.lane.b32.xlu1 %v476_v32, %s1065_s3 }
 0x882   :  { %v479_v36 = vpop.permute.xlu1 %478 }
 0x883   :  { %v481_v37 = vadd.f32 %v479_v36, %v471_v33 }
 0x885   :  { %893 = vtanh.f32 %v481_v37 }
 0x88b   :  { %v894_v38 = vpop.eup %893 }
 0x88c   :  { %484 = vrot.lane.b32.xlu2 %v894_v38, %s1064_s19 }
 0x8e6   :  { %v485_v39 = vpop.permute.xlu2 %484 }
 0x8e7   :  { %v487_v40 = vmul.f32 %v485_v39, %v468_v31  ;;  %v188_v39 = vadd.f32 %v1147_v34, %v1167_v5 }
 0x8e9   :  { %489 = vrot.lane.b32.xlu0 %v487_v40, %s1065_s3  ;;  %v228_v40 = vpop.f32.mrf.mxu1 }
 0x8ea   :  { %v229_v41 = vadd.f32 %v228_v40, %v188_v39 }
 0x95b   :  { %v490_v42 = vpop.permute.xlu0 %489 }
 0x95c   :  { %808 = vmatmul.msk.f32.vlgmr.msrb.gmra.mxu2 %vm127_vm0, %v490_v42 }
 0x9df   :  { %v510_v47 = vpop.f32.mrf.mxu2 }
 0x9e0   :  { %v513_v48 = vadd.f32 %v510_v47, %v223_v46 }
 0x9e2   :  { %895 = vtanh.f32 %v513_v48  ;;  %v809_v50 = vmul.f32 -1.442695, %v513_v48 }
 0x9e4   :  { %897 = vpow2.f32 %v809_v50 }
 0x9e8   :  { %v896_v49 = vpop.eup %895 }
 0x9e9   :  { %536 = vrot.lane.b32.xlu1 %v896_v49, %s1064_s19 }
 0x9ea   :  { %v898_v51 = vpop.eup %897 }
 0x9eb   :  { %v517_v52 = vadd.f32 1.0, %v898_v51 }
 0x9ed   :  { %899 = vrcp.f32 %v517_v52  ;;  %v529_v58 = vand.u32 2147483648, %v517_v52  ;;  %vm523_vm3 = vweird.f32 %v517_v52  ;;  %v527_v59 = vand.u32 2147483647, %v517_v52 }
 0x9ef   :  { %v530_v61 = vor.u32 1.1754944e-38, %v529_v58  ;;  %vm528_vm5 = vcmp.eq.f32.partialorder %v527_v59, 8.507059e+37 }
 0x9f3   :  { %v900_v53 = vpop.eup %899 }
 0x9f4   :  { %v519_v54 = vmul.f32 %v900_v53, %v517_v52  ;;  %vm524_vm2 = vweird.f32 %v900_v53 }
 0x9f5   :  { %vm525_vm4 = vmor %vm523_vm3, %vm524_vm2 }
 0x9f6   :  { %v520_v55 = vsub.f32 1.0, %v519_v54 }
 0x9f8   :  { %v521_v56 = vmul.f32 %v900_v53, %v520_v55 }
 0x9fa   :  { %v522_v57 = vadd.f32 %v900_v53, %v521_v56 }
 0x9fc   :  { %v526_v60 = vsel %vm525_vm4, %v900_v53, %v522_v57 }
 0x9fd   :  { %v531_v63 = vsel %vm528_vm5, %v530_v61, %v526_v60 }
 0x9fe   :  { %v534_v1 = vmul.f32 %v531_v63, %v481_v37 }
 0xa5b   :  { %v537_v62 = vpop.permute.xlu1 %536 }
 0xa5c   :  { %v539_v0 = vmul.f32 %v537_v62, %v531_v63 }
 0xa5e   :  { %541 = vrot.lane.b32.xlu2 %v539_v0, %s1065_s3 }
 0xab8   :  { %v542_v2 = vpop.permute.xlu2 %541 }
 0xab9   :  { %v544_v3 = vadd.f32 %v542_v2, %v534_v1  ;;  %v191_v2 = vadd.f32 %v1147_v34, %v1169_v6 }
 0xabb   :  { %901 = vtanh.f32 %v544_v3 }
 0xac1   :  { %v902_v4 = vpop.eup %901 }
 0xac2   :  { %547 = vrot.lane.b32.xlu0 %v902_v4, %s1064_s19 }
 0xb34   :  { %v548_v7 = vpop.permute.xlu0 %547 }
 0xb35   :  { %v550_v8 = vmul.f32 %v548_v7, %v531_v63 }
 0xb37   :  { %552 = vrot.lane.b32.xlu1 %v550_v8, %s1065_s3 }
 0xba9   :  { %v553_v9 = vpop.permute.xlu1 %552 }
 0xbaa   :  { %810 = vmatmul.msk.f32.vlgmr.msrb.gmra.mxu3 %vm127_vm0, %v553_v9 }
 0xc2d   :  { %v573_v13 = vpop.f32.mrf.mxu3 }
 0xc2e   :  { %v576_v14 = vadd.f32 %v573_v13, %v226_v12 }
 0xc30   :  { %903 = vtanh.f32 %v576_v14  ;;  %v811_v16 = vmul.f32 -1.442695, %v576_v14 }
 0xc32   :  { %905 = vpow2.f32 %v811_v16 }
 0xc36   :  { %v904_v15 = vpop.eup %903 }
 0xc37   :  { %599 = vrot.lane.b32.xlu2 %v904_v15, %s1064_s19 }
 0xc38   :  { %v906_v17 = vpop.eup %905 }
 0xc39   :  { %v580_v18 = vadd.f32 1.0, %v906_v17 }
 0xc3b   :  { %907 = vrcp.f32 %v580_v18  ;;  %v592_v29 = vand.u32 2147483648, %v580_v18  ;;  %vm586_vm7 = vweird.f32 %v580_v18  ;;  %v590_v35 = vand.u32 2147483647, %v580_v18 }
 0xc3d   :  { %v593_v22 = vor.u32 1.1754944e-38, %v592_v29  ;;  %vm591_vm9 = vcmp.eq.f32.partialorder %v590_v35, 8.507059e+37 }
 0xc41   :  { %v908_v25 = vpop.eup %907 }
 0xc42   :  { %v582_v19 = vmul.f32 %v908_v25, %v580_v18  ;;  %vm587_vm6 = vweird.f32 %v908_v25 }
 0xc43   :  { %vm588_vm8 = vmor %vm586_vm7, %vm587_vm6 }
 0xc44   :  { %v583_v27 = vsub.f32 1.0, %v582_v19 }
 0xc46   :  { %v584_v28 = vmul.f32 %v908_v25, %v583_v27 }
 0xc48   :  { %v585_v20 = vadd.f32 %v908_v25, %v584_v28 }
 0xc4a   :  { %v589_v21 = vsel %vm588_vm8, %v908_v25, %v585_v20 }
 0xc4b   :  { %v594_v24 = vsel %vm591_vm9, %v593_v22, %v589_v21  ;;  %v743_v22 = vld [vmem:[#allocation8 + $0x18] sm:$0xff] }
 0xc4c   :  { %v597_v30 = vmul.f32 %v594_v24, %v544_v3  ;;  %v231_v3 = vpop.f32.mrf.mxu1  ;;  %765 = vmatpush.msrb.mxu2 %v743_v22 }
 0xc4d   :  { %v232_v4 = vadd.f32 %v231_v3, %v191_v2 }
 0xc91   :  { %v600_v23 = vpop.permute.xlu2 %599 }
 0xc92   :  { %v602_v26 = vmul.f32 %v600_v23, %v594_v24  ;;  %v742_v23 = vld [vmem:[#allocation8 + $0x10] sm:$0xff] }
 0xc93   :  { %766 = vmatpush.msrb.mxu2 %v742_v23 }
 0xc94   :  { %604 = vrot.lane.b32.xlu0 %v602_v26, %s1065_s3  ;;  %v740_v26 = vld [vmem:[#allocation8] sm:$0xff] }
 0xd06   :  { %v605_v31 = vpop.permute.xlu0 %604 }
 0xd07   :  { %v607_v32 = vadd.f32 %v605_v31, %v597_v30 }
 0xd09   :  { %909 = vtanh.f32 %v607_v32 }
 0xd0f   :  { %v910_v33 = vpop.eup %909 }
 0xd10   :  { %610 = vrot.lane.b32.xlu1 %v910_v33, %s1064_s19  ;;  %v862_v33 = vld [vmem:[%s1235_s5] ss:$0 sm:$0xff] }
 0xd82   :  { %v611_v36 = vpop.permute.xlu1 %610 }
 0xd83   :  { %v613_v37 = vmul.f32 %v611_v36, %v594_v24  ;;  %v741_v24 = vld [vmem:[#allocation8 + $0x8] sm:$0xff] }
 0xd84   :  { %767 = vmatpush.msrb.mxu2 %v741_v24 }
 0xd85   :  { %615 = vrot.lane.b32.xlu2 %v613_v37, %s1065_s3 }
 0xd86   :  { %768 = vmatpush.msrb.mxu2 %v740_v26 }
 0xddf   :  { %v616_v38 = vpop.permute.xlu2 %615 }
 0xde0   :  { %812 = vmatmul.msk.f32.vlgmr.msra.gmra.mxu2 %vm127_vm0, %v616_v38 }
 0xe63   :  { %v636_v42 = vpop.f32.mrf.mxu2 }
 0xe64   :  { %v639_v43 = vadd.f32 %v636_v42, %v229_v41 }
 0xe66   :  { %911 = vtanh.f32 %v639_v43  ;;  %v813_v45 = vmul.f32 -1.442695, %v639_v43 }
 0xe68   :  { %913 = vpow2.f32 %v813_v45 }
 0xe6c   :  { %v912_v44 = vpop.eup %911 }
 0xe6d   :  { %662 = vrot.lane.b32.xlu0 %v912_v44, %s1064_s19 }
 0xe6e   :  { %v914_v46 = vpop.eup %913 }
 0xe6f   :  { %v643_v47 = vadd.f32 1.0, %v914_v46 }
 0xe71   :  { %915 = vrcp.f32 %v643_v47  ;;  %v655_v5 = vand.u32 2147483648, %v643_v47  ;;  %vm649_vm11 = vweird.f32 %v643_v47  ;;  %v653_v53 = vand.u32 2147483647, %v643_v47 }
 0xe73   :  { %v656_v55 = vor.u32 1.1754944e-38, %v655_v5  ;;  %vm654_vm13 = vcmp.eq.f32.partialorder %v653_v53, 8.507059e+37 }
 0xe77   :  { %v916_v48 = vpop.eup %915 }
 0xe78   :  { %v645_v49 = vmul.f32 %v916_v48, %v643_v47  ;;  %vm650_vm10 = vweird.f32 %v916_v48 }
 0xe79   :  { %vm651_vm12 = vmor %vm649_vm11, %vm650_vm10 }
 0xe7a   :  { %v646_v50 = vsub.f32 1.0, %v645_v49 }
 0xe7c   :  { %v647_v51 = vmul.f32 %v916_v48, %v646_v50 }
 0xe7e   :  { %v648_v52 = vadd.f32 %v916_v48, %v647_v51 }
 0xe80   :  { %v652_v54 = vsel %vm651_vm12, %v916_v48, %v648_v52 }
 0xe81   :  { %v657_v57 = vsel %vm654_vm13, %v656_v55, %v652_v54 }
 0xe82   :  { %v660_v59 = vmul.f32 %v657_v57, %v607_v32 }
 0xedf   :  { %v663_v56 = vpop.permute.xlu0 %662 }
 0xee0   :  { %v665_v58 = vmul.f32 %v663_v56, %v657_v57 }
 0xee2   :  { %667 = vrot.lane.b32.xlu1 %v665_v58, %s1065_s3 }
 0xf54   :  { %v668_v60 = vpop.permute.xlu1 %667 }
 0xf55   :  { %v670_v61 = vadd.f32 %v668_v60, %v660_v59 }
 0xf57   :  { %917 = vtanh.f32 %v670_v61 }
 0xf5d   :  { %v918_v62 = vpop.eup %917 }
 0xf5e   :  { %673 = vrot.lane.b32.xlu2 %v918_v62, %s1064_s19 }
 0xfb8   :  { %v674_v63 = vpop.permute.xlu2 %673 }
 0xfb9   :  { %v676_v0 = vmul.f32 %v674_v63, %v657_v57 }
 0xfbb   :  { %678 = vrot.lane.b32.xlu0 %v676_v0, %s1065_s3 }
0x102d   :  { %v679_v1 = vpop.permute.xlu0 %678 }
0x102e   :  { %814 = vmatmul.msk.f32.vlgmr.msra.gmra.mxu3 %vm127_vm0, %v679_v1 }
0x10b1   :  { %v699_v7 = vpop.f32.mrf.mxu3 }
0x10b2   :  { %v702_v8 = vadd.f32 %v699_v7, %v232_v4 }
0x10b4   :  { %919 = vtanh.f32 %v702_v8  ;;  %v815_v10 = vmul.f32 -1.442695, %v702_v8 }
0x10b6   :  { %921 = vpow2.f32 %v815_v10 }
0x10ba   :  { %v920_v9 = vpop.eup %919 }
0x10bb   :  { %725 = vrot.lane.b32.xlu1 %v920_v9, %s1064_s19 }
0x10bc   :  { %v922_v11 = vpop.eup %921 }
0x10bd   :  { %v706_v12 = vadd.f32 1.0, %v922_v11 }
0x10bf   :  { %923 = vrcp.f32 %v706_v12  ;;  %v718_v34 = vand.u32 2147483648, %v706_v12  ;;  %vm712_vm15 = vweird.f32 %v706_v12  ;;  %v716_v6 = vand.u32 2147483647, %v706_v12 }
0x10c1   :  { %v719_v25 = vor.u32 1.1754944e-38, %v718_v34  ;;  %vm717_vm2 = vcmp.eq.f32.partialorder %v716_v6, 8.507059e+37 }
0x10c5   :  { %v924_v13 = vpop.eup %923 }
0x10c6   :  { %v708_v14 = vmul.f32 %v924_v13, %v706_v12  ;;  %vm713_vm14 = vweird.f32 %v924_v13 }
0x10c7   :  { %vm714_vm1 = vmor %vm712_vm15, %vm713_vm14 }
0x10c8   :  { %v709_v15 = vsub.f32 1.0, %v708_v14 }
0x10ca   :  { %v710_v16 = vmul.f32 %v924_v13, %v709_v15 }
0x10cc   :  { %v711_v17 = vadd.f32 %v924_v13, %v710_v16 }
0x10ce   :  { %v715_v18 = vsel %vm714_vm1, %v924_v13, %v711_v17 }
0x10cf   :  { %v720_v27 = vsel %vm717_vm2, %v719_v25, %v715_v18 }
0x10d0   :  { %v723_v20 = vmul.f32 %v720_v27, %v670_v61 }
0x112d   :  { %v726_v19 = vpop.permute.xlu1 %725 }
0x112e   :  { %v728_v28 = vmul.f32 %v726_v19, %v720_v27 }
0x1130   :  { %730 = vrot.lane.b32.xlu2 %v728_v28, %s1065_s3 }
0x118a   :  { %v731_v29 = vpop.permute.xlu2 %730 }
0x118b   :  { %v733_v35 = vadd.f32 %v731_v29, %v723_v20 }
0x118d   :  { %925 = vtanh.f32 %v733_v35 }
0x1193   :  { %v926_v21 = vpop.eup %925 }
0x1194   :  { %736 = vrot.lane.b32.xlu0 %v926_v21, %s1064_s19 }
0x1206   :  { %v737_v30 = vpop.permute.xlu0 %736 }
0x1207   :  { %v739_v31 = vmul.f32 %v737_v30, %v720_v27 }
0x1209   :  { %749 = vrot.lane.b32.xlu1 %v739_v31, %s1065_s3 }
0x127b   :  { %v750_v32 = vpop.permute.xlu1 %749 }
0x127c   :  { %816 = vmatmul.msk.f32.vlgmr.msrb.gmra.mxu2 %vm127_vm0, %v750_v32 }
0x12ff   :  { %v770_v36 = vpop.f32.mrf.mxu2 }
0x1300   :  { %v771_v37 = vadd.f32 %v862_v33, %v770_v36 }
0x1302   :  { %773 = vst [vmem:[#allocation10] sm:$0xff] %v771_v37 }
0x1303   :  { %784 = dma.vmem_to_hbm [thread:$0]  %s780_s23, 128, %s782_s26, [#allocation4]  }
0x1304   :  { %1053 = dma.done.wait [#allocation4], 128  }
0x1305   :  { %1054 = vsyncadd [#allocation4], 4294967168 }
0x1306   :  { %789 = vsyncpa [#allocation3], 1 }
0x1307   :  { %790 = vsyncpa [#allocation6], 1 }
0x1308   :  { %791 = vsyncpa [#allocation9], 1 }
0x1309   :  { %792 = vsyncpa [#allocation4], 1 }

</bundles_post_ra>
